<compile_context>
chip_gen: v7x
topology: tpu7x:2x2x1
jax: 0.10.0
libtpu: 0.0.40
codegen_flags: <defaults>
</compile_context>

<pallas_src>
from functools import partial

import jax
import jax.numpy as jnp
from jax.experimental import pallas as pl
from jax.experimental.pallas import tpu as pltpu


def _round_up(x, m):
    return ((x + m - 1) // m) * m


def _discriminator_kernel(x_ref, w1_ref, b1_ref, w2_ref, b2_ref, w3_ref,
                          b3_ref, o_ref):
    # Transposed layout: batch is the lane axis.
    #   x_ref:  [4D, TB] f32   (tiled over the grid, auto double-buffered)
    #   w1_ref: [H1, 4D] bf16 ; b1_ref: [H1, 1] f32       (VMEM-resident)
    #   w2_ref: [H2, H1] bf16 ; b2_ref: [H2, 1] f32       (VMEM-resident)
    #   w3_ref: [H2, 1]  f32  ; b3_ref: [1, 1]  f32 (SMEM scalar)
    #   o_ref:  [1, TB]  f32   (lane-dense output row)
    x = x_ref[...].astype(jnp.bfloat16)          # in-kernel cast (VPU has slack)

    # Layer 1: single fused "concat + Linear" MXU dot, f32 accumulate.
    h1 = jnp.dot(w1_ref[...], x, preferred_element_type=jnp.float32) + b1_ref[...]
    h1 = jnp.maximum(h1, 0.0)                    # ReLU (f32, VPU)

    # Layer 2: bf16 MXU dot, f32 accumulate.
    h2 = jnp.dot(w2_ref[...], h1.astype(jnp.bfloat16),
                 preferred_element_type=jnp.float32) + b2_ref[...]
    h2 = jnp.maximum(h2, 0.0)                    # ReLU

    # Layer 3 (out_features = 1): keep full f32 precision - VPU multiply +
    # sublane reduce instead of an M=1 matmul; exact sigmoid (no approx recip).
    logits = jnp.sum(h2 * w3_ref[...], axis=0, keepdims=True) + b3_ref[0, 0]
    o_ref[...] = 1.0 / (1.0 + jnp.exp(-logits))


def prepare_params(params):
    """One-time parameter prep (hoisted out of the per-call forward path).

    `params` uses the [in, out] weight convention (transpose of PyTorch's
    [out, in]); the kernel consumes the transposed-network layout below.
    """
    w1, b1, w2, b2, w3, b3 = params
    return {
        "w1t": jnp.asarray(w1, jnp.float32).T.astype(jnp.bfloat16),   # [H1, 4D]
        "b1":  jnp.asarray(b1, jnp.float32).reshape(-1, 1),           # [H1, 1]
        "w2t": jnp.asarray(w2, jnp.float32).T.astype(jnp.bfloat16),   # [H2, H1]
        "b2":  jnp.asarray(b2, jnp.float32).reshape(-1, 1),           # [H2, 1]
        "w3":  jnp.asarray(w3, jnp.float32).reshape(-1, 1),           # [H2, 1]
        "b3":  jnp.asarray(b3, jnp.float32).reshape(1, 1),            # scalar
    }


@partial(jax.jit, static_argnames=("block_b",))
def discriminator_forward(x_r, x_a, a, r, prepared, *, block_b=4096):
    """Pallas equivalent of Discriminator.forward. Returns [B, 1] float32."""
    w1t, b1, w2t, b2, w3, b3 = (prepared[k]
                                for k in ("w1t", "b1", "w2t", "b2", "w3", "b3"))
    B, D = x_r.shape
    F = 4 * D
    H1 = w1t.shape[0]
    H2 = w2t.shape[0]

    # Fused, transposed "concat": one XLA copy producing [4D, B] f32.
    # Inputs stay f32 (no wrapper-side bf16 pass); the kernel casts on the VPU.
    x_t = jnp.concatenate([x_r.T, x_a.T, a.T, r.T], axis=0)

    # --- batch tiling on the lane axis (multiples of 128) ---
    b128 = _round_up(max(B, 1), 128)
    n_blocks = b128 // 128
    tb_blocks = max(1, min(block_b // 128, n_blocks))
    if n_blocks >= 2:
        # keep at least 2 grid steps so both v7x TensorCores get work
        tb_blocks = min(tb_blocks, -(-n_blocks // 2))
    tb = 128 * tb_blocks
    b_pad = _round_up(b128, tb)
    if b_pad != B:
        x_t = jnp.pad(x_t, ((0, 0), (0, b_pad - B)))
    grid = (b_pad // tb,)

    out = pl.pallas_call(
        _discriminator_kernel,
        out_shape=jax.ShapeDtypeStruct((1, b_pad), jnp.float32),
        grid=grid,
        in_specs=[
            pl.BlockSpec((F, tb), lambda i: (0, i)),     # x (tiled, lane-dense)
            pl.BlockSpec((H1, F), lambda i: (0, 0)),     # w1 (resident)
            pl.BlockSpec((H1, 1), lambda i: (0, 0)),     # b1
            pl.BlockSpec((H2, H1), lambda i: (0, 0)),    # w2 (resident)
            pl.BlockSpec((H2, 1), lambda i: (0, 0)),     # b2
            pl.BlockSpec((H2, 1), lambda i: (0, 0)),     # w3
            pl.BlockSpec(memory_space=pltpu.MemorySpace.SMEM),  # b3 scalar
        ],
        out_specs=pl.BlockSpec((1, tb), lambda i: (0, i)),
        compiler_params=pltpu.CompilerParams(
            dimension_semantics=("parallel",),
            vmem_limit_bytes=32 * 1024 * 1024,
        ),
    )(x_t, w1t, b1, w2t, b2, w3, b3)

    return out[0, :B][:, None]


def init_params(input_dim, key):
    """Deterministic parameter init mirroring nn.Linear shapes.

    PyTorch stores Linear weight as [out, in]; we store the transpose [in, out]
    so the f32 reference can do x @ W directly (same math).
    """
    k1, k2, k3 = jax.random.split(key, 3)
    f_in = 4 * input_dim

    def linear(k, fan_in, fan_out):
        bound = 1.0 / jnp.sqrt(fan_in)
        kw, kb = jax.random.split(k)
        w = jax.random.uniform(kw, (fan_in, fan_out), jnp.float32, -bound, bound)
        b = jax.random.uniform(kb, (fan_out,), jnp.float32, -bound, bound)
        return w, b

    w1, b1 = linear(k1, f_in, 128)
    w2, b2 = linear(k2, 128, 128)
    w3, b3 = linear(k3, 128, 1)
    return (w1, b1, w2, b2, w3, b3)


def reference_forward(x_r, x_a, a, r, params):
    """Pure-JAX f32 reference for correctness checking."""
    w1, b1, w2, b2, w3, b3 = params
    x = jnp.concatenate([x_r, x_a, a, r], axis=1)
    h1 = jnp.maximum(x @ w1 + b1, 0.0)
    h2 = jnp.maximum(h1 @ w2 + b2, 0.0)
    return jax.nn.sigmoid(h2 @ w3 + b3)


if __name__ == "__main__":
    input_dim = 16
    key = jax.random.PRNGKey(0)
    kx1, kx2, ka, kr, kp = jax.random.split(key, 5)
    params = init_params(input_dim, kp)
    prepared = prepare_params(params)      # one-time prep, hoisted out of forward

    # Case 1: default tile -> grid of 2 steps with a ragged last tile
    # (exercises padding + the parallel batch pipeline).
    batch = 300
    x_r = jax.random.normal(kx1, (batch, input_dim), jnp.float32)
    x_a = jax.random.normal(kx2, (batch, input_dim), jnp.float32)
    a = jax.random.normal(ka, (batch, input_dim), jnp.float32)
    r = jax.random.normal(kr, (batch, input_dim), jnp.float32)
    ref = reference_forward(x_r, x_a, a, r, params)

    out = discriminator_forward(x_r, x_a, a, r, prepared)
    out = jax.block_until_ready(out)
    assert out.shape == (batch, 1)
    # bf16 matmuls for layers 1-2 -> loosened tolerance vs f32 reference.
    assert jnp.allclose(out, ref, atol=2e-2, rtol=2e-2), float(
        jnp.max(jnp.abs(out - ref)))

    # Case 2: small explicit tile -> 3-step grid.
    out_b = discriminator_forward(x_r, x_a, a, r, prepared, block_b=128)
    out_b = jax.block_until_ready(out_b)
    assert jnp.allclose(out_b, ref, atol=2e-2, rtol=2e-2)

    # Case 3: tiny batch (single 128-wide tile).
    out_small = discriminator_forward(x_r[:4], x_a[:4], a[:4], r[:4], prepared)
    out_small = jax.block_until_ready(out_small)
    assert out_small.shape == (4, 1)
    assert jnp.allclose(out_small, ref[:4], atol=2e-2, rtol=2e-2)

    print("KERNEL_OK")
</pallas_src>

<mosaic_0001>
module attributes {stable_mosaic.version = 11 : i64} {
  func.func @_discriminator_kernel(%arg0: i32, %arg1: memref<64x256xf32, #tpu.memory_space<vmem>>, %arg2: memref<128x64xbf16, #tpu.memory_space<vmem>>, %arg3: memref<128x1xf32, #tpu.memory_space<vmem>>, %arg4: memref<128x128xbf16, #tpu.memory_space<vmem>>, %arg5: memref<128x1xf32, #tpu.memory_space<vmem>>, %arg6: memref<128x1xf32, #tpu.memory_space<vmem>>, %arg7: memref<1x1xf32, #tpu.memory_space<smem>>, %arg8: memref<1x256xf32, #tpu.memory_space<vmem>>) attributes {dimension_semantics = [#tpu.dimension_semantics<parallel>], iteration_bounds = array<i64: 2>, scalar_prefetch = 0 : i64, scratch_operands = 0 : i64, tpu.core_type = #tpu.core_type<tc>, window_params = [{transform_indices = @transform_0, window_bounds = array<i64: 64, 256>}, {pipeline_mode = #tpu.pipeline_mode<synchronous>, transform_indices = @transform_1, window_bounds = array<i64: 128, 64>}, {pipeline_mode = #tpu.pipeline_mode<synchronous>, transform_indices = @transform_2, window_bounds = array<i64: 128, 1>}, {pipeline_mode = #tpu.pipeline_mode<synchronous>, transform_indices = @transform_3, window_bounds = array<i64: 128, 128>}, {pipeline_mode = #tpu.pipeline_mode<synchronous>, transform_indices = @transform_4, window_bounds = array<i64: 128, 1>}, {pipeline_mode = #tpu.pipeline_mode<synchronous>, transform_indices = @transform_5, window_bounds = array<i64: 128, 1>}, {transform_indices = @transform_6, window_bounds = array<i64: 1, 1>}, {transform_indices = @transform_7, window_bounds = array<i64: 1, 256>}]} {
    %c0 = arith.constant 0 : index
    %c0_0 = arith.constant 0 : index
    %0 = vector.load %arg1[%c0, %c0_0] : memref<64x256xf32, #tpu.memory_space<vmem>>, vector<64x256xf32>
    %1 = arith.truncf %0 : vector<64x256xf32> to vector<64x256xbf16>
    %c0_1 = arith.constant 0 : index
    %c0_2 = arith.constant 0 : index
    %2 = vector.load %arg2[%c0_1, %c0_2] : memref<128x64xbf16, #tpu.memory_space<vmem>>, vector<128x64xbf16>
    %cst = arith.constant dense<0.000000e+00> : vector<128x256xf32>
    %3 = tpu.matmul %2, %1, %cst {dimension_numbers = #tpu.dot_dimension_numbers<[1], [0], [0], [1], [0, 0, 1, 1], [], []>} : vector<128x64xbf16>, vector<64x256xbf16>, vector<128x256xf32> -> vector<128x256xf32>
    %c0_3 = arith.constant 0 : index
    %c0_4 = arith.constant 0 : index
    %4 = vector.load %arg3[%c0_3, %c0_4] : memref<128x1xf32, #tpu.memory_space<vmem>>, vector<128x1xf32>
    %5 = vector.broadcast %4 : vector<128x1xf32> to vector<128x256xf32>
    %6 = arith.addf %3, %5 : vector<128x256xf32>
    %cst_5 = arith.constant 0.000000e+00 : f32
    %7 = vector.broadcast %cst_5 : f32 to vector<128x256xf32>
    %8 = arith.maximumf %6, %7 : vector<128x256xf32>
    %c0_6 = arith.constant 0 : index
    %c0_7 = arith.constant 0 : index
    %9 = vector.load %arg4[%c0_6, %c0_7] : memref<128x128xbf16, #tpu.memory_space<vmem>>, vector<128x128xbf16>
    %10 = arith.truncf %8 : vector<128x256xf32> to vector<128x256xbf16>
    %cst_8 = arith.constant dense<0.000000e+00> : vector<128x256xf32>
    %11 = tpu.matmul %9, %10, %cst_8 {dimension_numbers = #tpu.dot_dimension_numbers<[1], [0], [0], [1], [0, 0, 1, 1], [], []>} : vector<128x128xbf16>, vector<128x256xbf16>, vector<128x256xf32> -> vector<128x256xf32>
    %c0_9 = arith.constant 0 : index
    %c0_10 = arith.constant 0 : index
    %12 = vector.load %arg5[%c0_9, %c0_10] : memref<128x1xf32, #tpu.memory_space<vmem>>, vector<128x1xf32>
    %13 = vector.broadcast %12 : vector<128x1xf32> to vector<128x256xf32>
    %14 = arith.addf %11, %13 : vector<128x256xf32>
    %cst_11 = arith.constant 0.000000e+00 : f32
    %15 = vector.broadcast %cst_11 : f32 to vector<128x256xf32>
    %16 = arith.maximumf %14, %15 : vector<128x256xf32>
    %c0_12 = arith.constant 0 : index
    %c0_13 = arith.constant 0 : index
    %17 = vector.load %arg6[%c0_12, %c0_13] : memref<128x1xf32, #tpu.memory_space<vmem>>, vector<128x1xf32>
    %18 = vector.broadcast %17 : vector<128x1xf32> to vector<128x256xf32>
    %19 = arith.mulf %16, %18 : vector<128x256xf32>
    %cst_14 = arith.constant dense<0.000000e+00> : vector<256xf32>
    %20 = vector.multi_reduction <add>, %19, %cst_14 [0] : vector<128x256xf32> to vector<256xf32>
    %21 = vector.shape_cast %20 : vector<256xf32> to vector<1x256xf32>
    %c0_15 = arith.constant 0 : index
    %c0_16 = arith.constant 0 : index
    %22 = memref.load %arg7[%c0_15, %c0_16] : memref<1x1xf32, #tpu.memory_space<smem>>
    %23 = vector.broadcast %22 : f32 to vector<1x256xf32>
    %24 = arith.addf %21, %23 : vector<1x256xf32>
    %cst_17 = arith.constant 0.000000e+00 : f32
    %25 = vector.broadcast %cst_17 : f32 to vector<1x256xf32>
    %26 = arith.subf %25, %24 : vector<1x256xf32>
    %27 = math.exp %26 : vector<1x256xf32>
    %cst_18 = arith.constant 1.000000e+00 : f32
    %28 = vector.broadcast %cst_18 : f32 to vector<1x256xf32>
    %29 = arith.addf %28, %27 : vector<1x256xf32>
    %cst_19 = arith.constant 1.000000e+00 : f32
    %30 = vector.broadcast %cst_19 : f32 to vector<1x256xf32>
    %31 = arith.divf %30, %29 : vector<1x256xf32>
    %c0_20 = arith.constant 0 : index
    %c0_21 = arith.constant 0 : index
    %32 = vector.load %arg8[%c0_20, %c0_21] : memref<1x256xf32, #tpu.memory_space<vmem>>, vector<1x256xf32>
    tpu.vector_store %arg8[%c0_20, %c0_21], %31 {strides = array<i32>} : memref<1x256xf32, #tpu.memory_space<vmem>>, vector<1x256xf32>,
    return
  }
  func.func @transform_0(%arg0: i32) -> (i32, i32) {
    %c0_i32 = arith.constant 0 : i32
    %c0_i32_0 = arith.constant 0 : i32
    return %c0_i32, %arg0 : i32, i32
  }
  func.func @transform_1(%arg0: i32) -> (i32, i32) {
    %c0_i32 = arith.constant 0 : i32
    %c0_i32_0 = arith.constant 0 : i32
    %c0_i32_1 = arith.constant 0 : i32
    return %c0_i32, %c0_i32_0 : i32, i32
  }
  func.func @transform_2(%arg0: i32) -> (i32, i32) {
    %c0_i32 = arith.constant 0 : i32
    %c0_i32_0 = arith.constant 0 : i32
    %c0_i32_1 = arith.constant 0 : i32
    return %c0_i32, %c0_i32_0 : i32, i32
  }
  func.func @transform_3(%arg0: i32) -> (i32, i32) {
    %c0_i32 = arith.constant 0 : i32
    %c0_i32_0 = arith.constant 0 : i32
    %c0_i32_1 = arith.constant 0 : i32
    return %c0_i32, %c0_i32_0 : i32, i32
  }
  func.func @transform_4(%arg0: i32) -> (i32, i32) {
    %c0_i32 = arith.constant 0 : i32
    %c0_i32_0 = arith.constant 0 : i32
    %c0_i32_1 = arith.constant 0 : i32
    return %c0_i32, %c0_i32_0 : i32, i32
  }
  func.func @transform_5(%arg0: i32) -> (i32, i32) {
    %c0_i32 = arith.constant 0 : i32
    %c0_i32_0 = arith.constant 0 : i32
    %c0_i32_1 = arith.constant 0 : i32
    return %c0_i32, %c0_i32_0 : i32, i32
  }
  func.func @transform_6(%arg0: i32) -> (i32, i32) {
    %c0_i32 = arith.constant 0 : i32
    %c0_i32_0 = arith.constant 0 : i32
    %c0_i32_1 = arith.constant 0 : i32
    return %c0_i32, %c0_i32_0 : i32, i32
  }
  func.func @transform_7(%arg0: i32) -> (i32, i32) {
    %c0_i32 = arith.constant 0 : i32
    %c0_i32_0 = arith.constant 0 : i32
    return %c0_i32, %arg0 : i32, i32
  }
}

</mosaic_0001>

<bundles_post_ra>
// kernel: discriminator_forward.1
= control target key start
LH: loop header
LB: loop body
LE: loop exit
PB: predicated region body
PF: predicated region fallthrough
CT: control target
= control target key end

     0   :  { %s1759_s0 = inlined_call_operand.vmem [shape: f32[64,512], index: 0, kind: input, shape index: {}]   ;;  %s1760_s1 = inlined_call_operand.vmem [shape: bf16[128,64], index: 1, kind: input, shape index: {}]   ;;  %s1761_s2 = inlined_call_operand.vmem [shape: f32[128,1], index: 2, kind: input, shape index: {}]   ;;  %s1762_s3 = inlined_call_operand.vmem [shape: bf16[128,128], index: 3, kind: input, shape index: {}]   ;;  %s1763_s4 = inlined_call_operand.vmem [shape: f32[128,1], index: 4, kind: input, shape index: {}]   ;;  %s1764_s5 = inlined_call_operand.vmem [shape: f32[128,1], index: 5, kind: input, shape index: {}]   ;;  %s1765_s6 = inlined_call_operand.<no memory space> [shape: f32[1,1], index: 6, kind: input, shape index: {}]   ;;  %s1766_s7 = inlined_call_operand.vmem [shape: f32[1,512], index: 7, kind: output, shape index: {}]  }
   0x1   :  { %12 = sst [smem:[#allocation2]] %s1765_s6 }
   0x2   :  { %s1437_s26 = smov 0   ;;  %s1439_s27 = smov 0  }
   0x3   :  { %s1441_s28 = smov 0  }
   0x4 LB: > { %s1263_s6 = sadd.s32 4294967295, %s1390_s28   ;;  %s1454_s29 = sadd.s32 1, %s1390_s28   ;;  %s1390_s28 = sphi %s1441_s28, %s1769_s28   ;;  %s1386_s27 = sphi %s1439_s27, %s1768_s27   ;;  %s1382_s26 = sphi %s1437_s26, %s1767_s26  }
   0x5   : > { %s22_s30 = ssub.s32 %s1390_s28, %s1454_s29  ;;  %s25_s8 = sadd.s32 1, %s1386_s27 }
   0x6   : > { %p23_p0 = scmp.eq.s32.totalorder %s22_s30, 0  ;;  %p32_p1 = scmp.ne.s32.totalorder %s1386_s27, %s1382_s26 }
   0x7   : > { %p33_p2 = scmp.eq.s32.totalorder %s1390_s28, 0  ;;  %p1266_p4 = scmp.ge.s32.totalorder %s1390_s28, 2 }
   0x8   : > { %s1463_s9 = scalar_select %p23_p0, %s1386_s27, %s25_s8  }
   0x9   : > { %p34_p3 = por %p33_p2, %p32_p1  ;;  %228 = sbr.rel (%p1266_p4) target bundleno = 28 (0x1c), region = 40 }
  0x10   : > { %231 = sbr.rel (!%p34_p3) target bundleno = 28 (0x1c), region = 44  ;;  %s233_s10 = sand.u32 (%p34_p3), 1, %s1386_s27  }
  0x11   : > { %s1299_s11 = sshll.u32 (%p34_p3), %s1390_s28, 4  ;;  %s1267_s12 = sshll.u32 (%p34_p3), %s233_s10, 7 }
  0x12   : > { %s1471_s15 = scalar_lea.vmem (%p34_p3), %s1759_s0, %s1299_s11  ;;  %s235_s16 = scalar_lea.vmem (%p34_p3), [#allocation3], %s1267_s12 }
  0x13   : > { %v251_v0 = vld [vmem:[%s1471_s15] sm:$0xff] (%p34_p3)  ;;  %v253_v1 = vld [vmem:[%s1471_s15 + $0x8] sm:$0xff] (%p34_p3) }
  0x14   : > { %v255_v2 = vld [vmem:[%s1471_s15 + $0x20] sm:$0xff] (%p34_p3)  ;;  %252 = vst [vmem:[%s235_s16] sm:$0xff] (%p34_p3), %v251_v0  ;;  %254 = vst [vmem:[%s235_s16 + $0x8] sm:$0xff] (%p34_p3), %v253_v1  ;;  %v257_v3 = vld [vmem:[%s1471_s15 + $0x28] sm:$0xff] (%p34_p3) }
  0x15   : > { %256 = vst [vmem:[%s235_s16 + $0x10] sm:$0xff] (%p34_p3), %v255_v2  ;;  %v259_v4 = vld [vmem:[%s1471_s15 + $0x40] sm:$0xff] (%p34_p3)  ;;  %v261_v5 = vld [vmem:[%s1471_s15 + $0x48] sm:$0xff] (%p34_p3)  ;;  %258 = vst [vmem:[%s235_s16 + $0x18] sm:$0xff] (%p34_p3), %v257_v3 }
  0x16   : > { %260 = vst [vmem:[%s235_s16 + $0x20] sm:$0xff] (%p34_p3), %v259_v4  ;;  %262 = vst [vmem:[%s235_s16 + $0x28] sm:$0xff] (%p34_p3), %v261_v5  ;;  %v263_v6 = vld [vmem:[%s1471_s15 + $0x60] sm:$0xff] (%p34_p3)  ;;  %v265_v7 = vld [vmem:[%s1471_s15 + $0x68] sm:$0xff] (%p34_p3) }
  0x17   : > { %v267_v8 = vld [vmem:[%s1471_s15 + $0x80] sm:$0xff]  ;;  %264 = vst [vmem:[%s235_s16 + $0x30] sm:$0xff] %v263_v6  ;;  %266 = vst [vmem:[%s235_s16 + $0x38] sm:$0xff] %v265_v7  ;;  %v269_v9 = vld [vmem:[%s1471_s15 + $0x88] sm:$0xff] }
  0x18   : > { %268 = vst [vmem:[%s235_s16 + $0x40] sm:$0xff] %v267_v8  ;;  %v271_v10 = vld [vmem:[%s1471_s15 + $0xa0] sm:$0xff]  ;;  %v273_v11 = vld [vmem:[%s1471_s15 + $0xa8] sm:$0xff]  ;;  %270 = vst [vmem:[%s235_s16 + $0x48] sm:$0xff] %v269_v9 }
  0x19   : > { %272 = vst [vmem:[%s235_s16 + $0x50] sm:$0xff] %v271_v10  ;;  %274 = vst [vmem:[%s235_s16 + $0x58] sm:$0xff] %v273_v11  ;;  %v275_v12 = vld [vmem:[%s1471_s15 + $0xc0] sm:$0xff]  ;;  %v277_v13 = vld [vmem:[%s1471_s15 + $0xc8] sm:$0xff] }
  0x1a   : > { %v279_v14 = vld [vmem:[%s1471_s15 + $0xe0] sm:$0xff]  ;;  %276 = vst [vmem:[%s235_s16 + $0x60] sm:$0xff] %v275_v12  ;;  %278 = vst [vmem:[%s235_s16 + $0x68] sm:$0xff] %v277_v13  ;;  %v281_v15 = vld [vmem:[%s1471_s15 + $0xe8] sm:$0xff] }
  0x1b   : > { %280 = vst [vmem:[%s235_s16 + $0x70] sm:$0xff] %v279_v14  ;;  %282 = vst [vmem:[%s235_s16 + $0x78] sm:$0xff] %v281_v15 }
  0x1c PF: > { %p1270_p5 = scmp.ge.s32.totalorder %s1390_s28, 1  ;;  %p287_p6 = scmp.lt.s32.totalorder %s1390_s28, 3 }
  0x1e   : > { %p288_p7 = pnand %p1270_p5, %p287_p6 }
  0x1f   : > { %s294_s17 = sand.u32 (!%p288_p7), 1, %s1382_s26   ;;  %v1392_v16 = vmov (!%p288_p7), 0   ;;  %v371_v17 = vld [vmem:[%s1761_s2] sm:$0xff] (!%p288_p7)  ;;  %v372_v18 = vld [vmem:[%s1761_s2 + $0x8] sm:$0xff] (!%p288_p7)  ;;  %v373_v37 = vld [vmem:[%s1761_s2 + $0x10] sm:$0xff] (!%p288_p7)  ;;  %vm507_vm0 = vcmask (!%p288_p7), 523264  }
  0x20   : > { %291 = sbr.rel (%p288_p7) target bundleno = 654 (0x28e), region = 67  ;;  %s1271_s18 = sshll.u32 (!%p288_p7), %s294_s17, 7  ;;  %564 = vmatprep.mubr.bf16.mxu0 (!%p288_p7), %v1392_v16  ;;  %1342 = vset.pattern.permute.xlu0 (!%p288_p7), %v1392_v16  ;;  %v375_v38 = vld [vmem:[%s1761_s2 + $0x20] sm:$0xff] (!%p288_p7)  ;;  %v374_v40 = vld [vmem:[%s1761_s2 + $0x18] sm:$0xff] (!%p288_p7)  ;;  %v377_v42 = vld [vmem:[%s1761_s2 + $0x30] sm:$0xff] (!%p288_p7) }
  0x21   : > { %389 = vperm.xlu0 (!%p288_p7), %1342, %v371_v17   ;;  %1343 = vset.pattern.permute.xlu1 (!%p288_p7), %v1392_v16  ;;  %s1501_s23 = scalar_lea.vmem (!%p288_p7), [#allocation3], %s1271_s18  ;;  %v376_v46 = vld [vmem:[%s1761_s2 + $0x28] sm:$0xff] (!%p288_p7)  ;;  %v379_v48 = vld [vmem:[%s1761_s2 + $0x40] sm:$0xff] (!%p288_p7)  ;;  %v378_v50 = vld [vmem:[%s1761_s2 + $0x38] sm:$0xff] (!%p288_p7)  ;;  %s1168_s15 = sld [smem:[#allocation2]] (!%p288_p7) }
  0x22   : > { %v332_v19 = vld [vmem:[%s1501_s23 + $0x8] sm:$0xff] (!%p288_p7)  ;;  %v334_v20 = vld [vmem:[%s1501_s23 + $0x18] sm:$0xff] (!%p288_p7)  ;;  %v331_v21 = vld [vmem:[%s1501_s23] sm:$0xff] (!%p288_p7)  ;;  %895 = vmatprep.mubr.bf16.mxu1 (!%p288_p7), %v1392_v16  ;;  %399 = vperm.xlu1 (!%p288_p7), %1343, %v373_v37   ;;  %s1272_s16 = sshll.u32 (!%p288_p7), %s1263_s6, 1 }
  0x23   : > { %v348_v22 = vpack.c.bf16 (!%p288_p7), %v334_v20, %v332_v19  ;;  %v333_v23 = vld [vmem:[%s1501_s23 + $0x10] sm:$0xff] (!%p288_p7)  ;;  %v336_v24 = vld [vmem:[%s1501_s23 + $0x28] sm:$0xff] (!%p288_p7)  ;;  %v338_v25 = vld [vmem:[%s1501_s23 + $0x38] sm:$0xff] (!%p288_p7)  ;;  %p326_p8 = scmp.lt.s32.totalorder (!%p288_p7), %s1272_s16, 3 }
  0x24   : > { %v347_v26 = vpack.c.bf16 (!%p288_p7), %v333_v23, %v331_v21  ;;  %v350_v27 = vpack.c.bf16 (!%p288_p7), %v338_v25, %v336_v24  ;;  %v335_v28 = vld [vmem:[%s1501_s23 + $0x20] sm:$0xff] (!%p288_p7)  ;;  %v337_v29 = vld [vmem:[%s1501_s23 + $0x30] sm:$0xff] (!%p288_p7)  ;;  %v340_v30 = vld [vmem:[%s1501_s23 + $0x48] sm:$0xff] (!%p288_p7) }
  0x25   : > { %532 = vmatprep.subr.bf16.mxu0 (!%p288_p7), %v348_v22  ;;  %v342_v31 = vld [vmem:[%s1501_s23 + $0x58] sm:$0xff] (!%p288_p7)  ;;  %394 = vperm.xlu0 (!%p288_p7), %1342, %v372_v18   ;;  %v349_v32 = vpack.c.bf16 (!%p288_p7), %v337_v29, %v335_v28  ;;  %v339_v33 = vld [vmem:[%s1501_s23 + $0x40] sm:$0xff] (!%p288_p7)  ;;  %v341_v34 = vld [vmem:[%s1501_s23 + $0x50] sm:$0xff] (!%p288_p7) }
  0x26   : > { %533 = vmatpush1.bf16.msra.mxu0 (!%p288_p7), %v347_v26  ;;  %v352_v35 = vpack.c.bf16 (!%p288_p7), %v342_v31, %v340_v30  ;;  %v344_v36 = vld [vmem:[%s1501_s23 + $0x68] sm:$0xff] (!%p288_p7)  ;;  %v346_v39 = vld [vmem:[%s1501_s23 + $0x78] sm:$0xff] (!%p288_p7)  ;;  %v351_v41 = vpack.c.bf16 (!%p288_p7), %v341_v34, %v339_v33  ;;  %v343_v44 = vld [vmem:[%s1501_s23 + $0x60] sm:$0xff] (!%p288_p7)  ;;  %404 = vperm.xlu1 (!%p288_p7), %1343, %v374_v40  }
  0x27   : > { %534 = vmatprep.subr.bf16.mxu0 %v350_v27  ;;  %v354_v43 = vpack.c.bf16 %v346_v39, %v344_v36  ;;  %v345_v45 = vld [vmem:[%s1501_s23 + $0x70] sm:$0xff]  ;;  %v1344_v49 = vld [vmem:[%s1760_s1] sm:$0xff]   ;;  %v380_v52 = vld [vmem:[%s1761_s2 + $0x48] sm:$0xff]  ;;  %s1771_s16 = smov (!%p326_p8, %s1272_s16), 3 }
  0x28   : > { %v353_v47 = vpack.c.bf16 %v345_v45, %v343_v44  ;;  %v381_v51 = vld [vmem:[%s1761_s2 + $0x50] sm:$0xff]  ;;  %v383_v53 = vld [vmem:[%s1761_s2 + $0x60] sm:$0xff]  ;;  %v1345_v54 = vld [vmem:[%s1760_s1 + $0x8] sm:$0xff]   ;;  %s328_s19 = scalar_lea.vmem %s1766_s7, %s1771_s16 }
  0x29   : > { %409 = vperm.xlu0 %1342, %v375_v38   ;;  %v382_v55 = vld [vmem:[%s1761_s2 + $0x58] sm:$0xff]  ;;  %v385_v56 = vld [vmem:[%s1761_s2 + $0x70] sm:$0xff]  ;;  %v384_v57 = vld [vmem:[%s1761_s2 + $0x68] sm:$0xff] }
  0x2a   : > { %535 = vmatpush1.bf16.msra.mxu0 %v349_v32  ;;  %414 = vperm.xlu1 %1343, %v376_v46   ;;  %v709_v58 = vld [vmem:[%s1763_s4] sm:$0xff]  ;;  %v1346_v59 = vld [vmem:[%s1760_s1 + $0x10] sm:$0xff]   ;;  %v386_v60 = vld [vmem:[%s1761_s2 + $0x78] sm:$0xff] }
  0x2b   : > { %536 = vmatprep.subr.bf16.mxu0 %v352_v35  ;;  %v711_v61 = vld [vmem:[%s1763_s4 + $0x10] sm:$0xff]  ;;  %v710_v62 = vld [vmem:[%s1763_s4 + $0x8] sm:$0xff]  ;;  %v998_v63 = vld [vmem:[%s1764_s5] sm:$0xff] }
  0x2c   : > { %v1347_v0 = vld [vmem:[%s1760_s1 + $0x18] sm:$0xff]   ;;  %v713_v2 = vld [vmem:[%s1763_s4 + $0x20] sm:$0xff]  ;;  %v999_v3 = vld [vmem:[%s1764_s5 + $0x8] sm:$0xff] }
  0x2d   : > { %419 = vperm.xlu0 %1342, %v377_v42   ;;  %v712_v1 = vld [vmem:[%s1763_s4 + $0x18] sm:$0xff]  ;;  %v714_v4 = vld [vmem:[%s1763_s4 + $0x28] sm:$0xff]  ;;  %v1348_v5 = vld [vmem:[%s1760_s1 + $0x20] sm:$0xff]  }
  0x2e   : > { %537 = vmatpush1.bf16.msra.mxu0 %v351_v41  ;;  %424 = vperm.xlu1 %1343, %v378_v50   ;;  %v1000_v6 = vld [vmem:[%s1764_s5 + $0x10] sm:$0xff]  ;;  %v1001_v8 = vld [vmem:[%s1764_s5 + $0x18] sm:$0xff]  ;;  %v1349_v10 = vld [vmem:[%s1760_s1 + $0x28] sm:$0xff]  }
  0x2f   : > { %538 = vmatprep.subr.bf16.mxu0 %v354_v43  ;;  %v715_v7 = vld [vmem:[%s1763_s4 + $0x30] sm:$0xff]  ;;  %v716_v9 = vld [vmem:[%s1763_s4 + $0x38] sm:$0xff]  ;;  %v1002_v11 = vld [vmem:[%s1764_s5 + $0x20] sm:$0xff] }
  0x30   : > { %v717_v12 = vld [vmem:[%s1763_s4 + $0x40] sm:$0xff]  ;;  %v1003_v13 = vld [vmem:[%s1764_s5 + $0x28] sm:$0xff]  ;;  %v1350_v15 = vld [vmem:[%s1760_s1 + $0x30] sm:$0xff]  }
  0x31   : > { %429 = vperm.xlu0 %1342, %v379_v48   ;;  %v718_v14 = vld [vmem:[%s1763_s4 + $0x48] sm:$0xff]  ;;  %v1004_v17 = vld [vmem:[%s1764_s5 + $0x30] sm:$0xff]  ;;  %v1005_v19 = vld [vmem:[%s1764_s5 + $0x38] sm:$0xff] }
  0x32   : > { %539 = vmatpush1.bf16.msra.mxu0 %v353_v47  ;;  %434 = vperm.xlu1 %1343, %v380_v52   ;;  %v719_v18 = vld [vmem:[%s1763_s4 + $0x50] sm:$0xff]  ;;  %v720_v20 = vld [vmem:[%s1763_s4 + $0x58] sm:$0xff]  ;;  %v1006_v22 = vld [vmem:[%s1764_s5 + $0x40] sm:$0xff] }
  0x33   : > { %v1351_v21 = vld [vmem:[%s1760_s1 + $0x38] sm:$0xff]   ;;  %v721_v23 = vld [vmem:[%s1763_s4 + $0x60] sm:$0xff]  ;;  %v1007_v24 = vld [vmem:[%s1764_s5 + $0x48] sm:$0xff] }
  0x34   : > { %v722_v25 = vld [vmem:[%s1763_s4 + $0x68] sm:$0xff]  ;;  %v1008_v26 = vld [vmem:[%s1764_s5 + $0x50] sm:$0xff]  ;;  %v1009_v28 = vld [vmem:[%s1764_s5 + $0x58] sm:$0xff] }
  0x35   : > { %1281 = vmatmul.mubr.msk.bf16.vlgmr.msra.gmra.mrb[0].mxu0 %vm507_vm0, %v1344_v49  ;;  %439 = vperm.xlu0 %1342, %v381_v51   ;;  %v723_v27 = vld [vmem:[%s1763_s4 + $0x70] sm:$0xff]  ;;  %v724_v29 = vld [vmem:[%s1763_s4 + $0x78] sm:$0xff]  ;;  %v1010_v30 = vld [vmem:[%s1764_s5 + $0x60] sm:$0xff] }
  0x36   : > { %574 = vmatprep.mubr.bf16.mxu0 %v1392_v16  ;;  %444 = vperm.xlu1 %1343, %v382_v55   ;;  %v1012_v31 = vld [vmem:[%s1764_s5 + $0x70] sm:$0xff]  ;;  %v1011_v32 = vld [vmem:[%s1764_s5 + $0x68] sm:$0xff]  ;;  %v1013_v33 = vld [vmem:[%s1764_s5 + $0x78] sm:$0xff] }
  0x39   : > { %449 = vperm.xlu0 %1342, %v383_v53  }
  0x3a   : > { %454 = vperm.xlu1 %1343, %v384_v57  }
  0x3d   : > { %1282 = vmatmul.mubr.msk.bf16.gmra.mrb[4].mxu0 %vm507_vm0, %v1345_v54  ;;  %459 = vperm.xlu0 %1342, %v385_v56  }
  0x3e   : > { %584 = vmatprep.mubr.bf16.mxu0 %v1392_v16  ;;  %464 = vperm.xlu1 %1343, %v386_v60  }
  0x41   : > { %727 = vperm.xlu0 %1342, %v709_v58  }
  0x42   : > { %732 = vperm.xlu1 %1343, %v710_v62  }
  0x45   : > { %1283 = vmatmul.mubr.msk.bf16.gmra.mrb[8].mxu0 %vm507_vm0, %v1346_v59  ;;  %737 = vperm.xlu0 %1342, %v711_v61  }
  0x46   : > { %594 = vmatprep.mubr.bf16.mxu0 %v1392_v16  ;;  %742 = vperm.xlu1 %1343, %v712_v1  }
  0x49   : > { %1016 = vperm.xlu0 %1342, %v998_v63  }
  0x4a   : > { %1021 = vperm.xlu1 %1343, %v999_v3  }
  0x4d   : > { %1284 = vmatmul.mubr.msk.bf16.gmra.mrb[12].mxu0 %vm507_vm0, %v1347_v0  ;;  %747 = vperm.xlu0 %1342, %v713_v2  }
  0x4e   : > { %604 = vmatprep.mubr.bf16.mxu0 %v1392_v16  ;;  %1026 = vperm.xlu1 %1343, %v1000_v6  }
  0x51   : > { %752 = vperm.xlu0 %1342, %v714_v4  }
  0x52   : > { %1031 = vperm.xlu1 %1343, %v1001_v8  }
  0x55   : > { %1285 = vmatmul.mubr.msk.bf16.gmra.mrb[16].mxu0 %vm507_vm0, %v1348_v5  ;;  %757 = vperm.xlu0 %1342, %v715_v7  }
  0x56   : > { %614 = vmatprep.mubr.bf16.mxu0 %v1392_v16  ;;  %1036 = vperm.xlu1 %1343, %v1002_v11  }
  0x59   : > { %762 = vperm.xlu0 %1342, %v716_v9  }
  0x5a   : > { %1041 = vperm.xlu1 %1343, %v1003_v13  }
  0x5d   : > { %1286 = vmatmul.mubr.msk.bf16.gmra.mrb[20].mxu0 %vm507_vm0, %v1349_v10  ;;  %767 = vperm.xlu0 %1342, %v717_v12  }
  0x5e   : > { %624 = vmatprep.mubr.bf16.mxu0 %v1392_v16  ;;  %1046 = vperm.xlu1 %1343, %v1004_v17  }
  0x61   : > { %772 = vperm.xlu0 %1342, %v718_v14  }
  0x62   : > { %1051 = vperm.xlu1 %1343, %v1005_v19  }
  0x65   : > { %1287 = vmatmul.mubr.msk.bf16.gmra.mrb[24].mxu0 %vm507_vm0, %v1350_v15  ;;  %777 = vperm.xlu0 %1342, %v719_v18  }
  0x66   : > { %634 = vmatprep.mubr.bf16.mxu0 %v1392_v16  ;;  %1056 = vperm.xlu1 %1343, %v1006_v22  }
  0x69   : > { %782 = vperm.xlu0 %1342, %v720_v20  }
  0x6a   : > { %1061 = vperm.xlu1 %1343, %v1007_v24  }
  0x6d   : > { %1288 = vmatmul.mubr.msk.bf16.gmra.mrb[28].mxu0 %vm507_vm0, %v1351_v21  ;;  %787 = vperm.xlu0 %1342, %v721_v23  }
  0x6e   : > { %885 = vmatprep.mubr.bf16.mxu0 %v1392_v16  ;;  %1066 = vperm.xlu1 %1343, %v1008_v26  }
  0x71   : > { %792 = vperm.xlu0 %1342, %v722_v25  }
  0x72   : > { %1071 = vperm.xlu1 %1343, %v1009_v28  }
  0x75   : > { %797 = vperm.xlu0 %1342, %v723_v27  }
  0x76   : > { %1076 = vperm.xlu1 %1343, %v1010_v30  }
  0x79   : > { %802 = vperm.xlu0 %1342, %v724_v29  }
  0x7a   : > { %1081 = vperm.xlu1 %1343, %v1011_v32  }
  0x7d   : > { %1086 = vperm.xlu0 %1342, %v1012_v31  }
  0x7e   : > { %1091 = vperm.xlu1 %1343, %v1013_v33  }
  0xa0   : > { %v390_v34 = vpop.permute.xlu0 %389 }
  0xa1   : > { %v400_v43 = vpop.permute.xlu1 %399 }
  0xa4   : > { %v395_v38 = vpop.permute.xlu0 %394 }
  0xa5   : > { %v405_v54 = vpop.permute.xlu1 %404 }
  0xa8   : > { %v410_v1 = vpop.permute.xlu0 %409 }
  0xa9   : > { %v415_v6 = vpop.permute.xlu1 %414 }
  0xac   : > { %v420_v18 = vpop.permute.xlu0 %419 }
  0xad   : > { %v425_v23 = vpop.permute.xlu1 %424 }
 0x108   : > { %v566_v35 = vpop.f32.mrb[0].mxu0 }
 0x109   : > { %v567_v36 = vadd.f32 %v566_v35, %v390_v34  ;;  %v568_v37 = vpop.f32.mrb[1].mxu0 }
 0x10a   : > { %v569_v39 = vadd.f32 %v568_v37, %v390_v34  ;;  %v570_v40 = vpop.f32.mrb[2].mxu0  ;;  %v430_v34 = vpop.permute.xlu0 %429 }
 0x10b   : > { %v571_v41 = vadd.f32 %v570_v40, %v395_v38  ;;  %v572_v42 = vpop.f32.mrb[3].mxu0  ;;  %v645_v45 = vmax.f32 %v567_v36, 0.0 }
 0x10c   : > { %v573_v44 = vadd.f32 %v572_v42, %v395_v38  ;;  %v646_v47 = vmax.f32 %v569_v39, 0.0  ;;  %v435_v39 = vpop.permute.xlu1 %434 }
 0x10d   : > { %v647_v46 = vmax.f32 %v571_v41, 0.0 }
 0x10e   : > { %v648_v48 = vmax.f32 %v573_v44, 0.0 }
 0x10f   : > { %v693_v49 = vpack.c.bf16 %v647_v46, %v645_v45 }
 0x110   : > { %v694_v50 = vpack.c.bf16 %v648_v48, %v646_v47  ;;  %v576_v51 = vpop.f32.mrb[4].mxu0 }
 0x111   : > { %v577_v52 = vadd.f32 %v576_v51, %v400_v43  ;;  %v578_v53 = vpop.f32.mrb[5].mxu0 }
 0x112   : > { %v579_v55 = vadd.f32 %v578_v53, %v400_v43  ;;  %v580_v56 = vpop.f32.mrb[6].mxu0  ;;  %853 = vmatprep.subr.bf16.mxu0 %v694_v50  ;;  %1300 = vmatprep.subr.bf16.mxu1 %v694_v50  ;;  %v440_v50 = vpop.permute.xlu0 %439 }
 0x113   : > { %v581_v57 = vadd.f32 %v580_v56, %v405_v54  ;;  %v582_v58 = vpop.f32.mrb[7].mxu0  ;;  %854 = vmatpush1.bf16.msra.mxu0 %v693_v49  ;;  %1308 = vmatpush1.bf16.msra.mxu1 %v693_v49  ;;  %v649_v60 = vmax.f32 %v577_v52, 0.0 }
 0x114   : > { %v583_v59 = vadd.f32 %v582_v58, %v405_v54  ;;  %v650_v62 = vmax.f32 %v579_v55, 0.0  ;;  %v445_v55 = vpop.permute.xlu1 %444 }
 0x115   : > { %v651_v61 = vmax.f32 %v581_v57, 0.0 }
 0x116   : > { %v652_v63 = vmax.f32 %v583_v59, 0.0 }
 0x117   : > { %v695_v0 = vpack.c.bf16 %v651_v61, %v649_v60 }
 0x118   : > { %v696_v2 = vpack.c.bf16 %v652_v63, %v650_v62  ;;  %v586_v3 = vpop.f32.mrb[8].mxu0 }
 0x119   : > { %v587_v4 = vadd.f32 %v586_v3, %v410_v1  ;;  %v588_v5 = vpop.f32.mrb[9].mxu0 }
 0x11a   : > { %v589_v7 = vadd.f32 %v588_v5, %v410_v1  ;;  %v590_v8 = vpop.f32.mrb[10].mxu0  ;;  %855 = vmatprep.subr.bf16.mxu0 %v696_v2  ;;  %1301 = vmatprep.subr.bf16.mxu1 %v696_v2  ;;  %v450_v2 = vpop.permute.xlu0 %449 }
 0x11b   : > { %v591_v9 = vadd.f32 %v590_v8, %v415_v6  ;;  %v592_v10 = vpop.f32.mrb[11].mxu0  ;;  %856 = vmatpush1.bf16.msra.mxu0 %v695_v0  ;;  %1309 = vmatpush1.bf16.msra.mxu1 %v695_v0  ;;  %v653_v12 = vmax.f32 %v587_v4, 0.0 }
 0x11c   : > { %v593_v11 = vadd.f32 %v592_v10, %v415_v6  ;;  %v654_v14 = vmax.f32 %v589_v7, 0.0  ;;  %v455_v7 = vpop.permute.xlu1 %454 }
 0x11d   : > { %v655_v13 = vmax.f32 %v591_v9, 0.0 }
 0x11e   : > { %v656_v15 = vmax.f32 %v593_v11, 0.0 }
 0x11f   : > { %v697_v17 = vpack.c.bf16 %v655_v13, %v653_v12 }
 0x120   : > { %v698_v19 = vpack.c.bf16 %v656_v15, %v654_v14  ;;  %v596_v20 = vpop.f32.mrb[12].mxu0 }
 0x121   : > { %v597_v21 = vadd.f32 %v596_v20, %v420_v18  ;;  %v598_v22 = vpop.f32.mrb[13].mxu0 }
 0x122   : > { %v599_v24 = vadd.f32 %v598_v22, %v420_v18  ;;  %v600_v25 = vpop.f32.mrb[14].mxu0  ;;  %857 = vmatprep.subr.bf16.mxu0 %v698_v19  ;;  %1302 = vmatprep.subr.bf16.mxu1 %v698_v19  ;;  %v460_v19 = vpop.permute.xlu0 %459 }
 0x123   : > { %v601_v26 = vadd.f32 %v600_v25, %v425_v23  ;;  %v602_v27 = vpop.f32.mrb[15].mxu0  ;;  %858 = vmatpush1.bf16.msra.mxu0 %v697_v17  ;;  %1310 = vmatpush1.bf16.msra.mxu1 %v697_v17  ;;  %v657_v29 = vmax.f32 %v597_v21, 0.0 }
 0x124   : > { %v603_v28 = vadd.f32 %v602_v27, %v425_v23  ;;  %v658_v31 = vmax.f32 %v599_v24, 0.0  ;;  %v465_v24 = vpop.permute.xlu1 %464 }
 0x125   : > { %v659_v30 = vmax.f32 %v601_v26, 0.0 }
 0x126   : > { %v660_v32 = vmax.f32 %v603_v28, 0.0 }
 0x127   : > { %v699_v33 = vpack.c.bf16 %v659_v30, %v657_v29 }
 0x128   : > { %v700_v35 = vpack.c.bf16 %v660_v32, %v658_v31  ;;  %v606_v36 = vpop.f32.mrb[16].mxu0 }
 0x129   : > { %v607_v37 = vadd.f32 %v606_v36, %v430_v34  ;;  %v608_v38 = vpop.f32.mrb[17].mxu0  ;;  %v1352_v36 = vld [vmem:[%s1762_s3] sm:$0xff]  }
 0x12a   : > { %v609_v40 = vadd.f32 %v608_v38, %v430_v34  ;;  %v610_v41 = vpop.f32.mrb[18].mxu0  ;;  %859 = vmatprep.subr.bf16.mxu0 %v700_v35  ;;  %1303 = vmatprep.subr.bf16.mxu1 %v700_v35  ;;  %v1354_v38 = vld [vmem:[%s1762_s3 + $0x10] sm:$0xff]  }
 0x12b   : > { %v611_v42 = vadd.f32 %v610_v41, %v435_v39  ;;  %v612_v43 = vpop.f32.mrb[19].mxu0  ;;  %860 = vmatpush1.bf16.msra.mxu0 %v699_v33  ;;  %1311 = vmatpush1.bf16.msra.mxu1 %v699_v33  ;;  %v661_v45 = vmax.f32 %v607_v37, 0.0  ;;  %v1353_v37 = vld [vmem:[%s1762_s3 + $0x8] sm:$0xff]  }
 0x12c   : > { %v613_v44 = vadd.f32 %v612_v43, %v435_v39  ;;  %v662_v47 = vmax.f32 %v609_v40, 0.0  ;;  %v1355_v39 = vld [vmem:[%s1762_s3 + $0x18] sm:$0xff]   ;;  %v1356_v40 = vld [vmem:[%s1762_s3 + $0x20] sm:$0xff]   ;;  %v1357_v41 = vld [vmem:[%s1762_s3 + $0x28] sm:$0xff]  }
 0x12d   : > { %v663_v46 = vmax.f32 %v611_v42, 0.0  ;;  %v1358_v42 = vld [vmem:[%s1762_s3 + $0x30] sm:$0xff]   ;;  %v1359_v43 = vld [vmem:[%s1762_s3 + $0x38] sm:$0xff]  }
 0x12e   : > { %v664_v48 = vmax.f32 %v613_v44, 0.0  ;;  %v728_v44 = vpop.permute.xlu0 %727 }
 0x12f   : > { %v701_v49 = vpack.c.bf16 %v663_v46, %v661_v45  ;;  %v733_v45 = vpop.permute.xlu1 %732 }
 0x130   : > { %v702_v51 = vpack.c.bf16 %v664_v48, %v662_v47  ;;  %v616_v52 = vpop.f32.mrb[20].mxu0 }
 0x131   : > { %v617_v53 = vadd.f32 %v616_v52, %v440_v50  ;;  %v618_v54 = vpop.f32.mrb[21].mxu0 }
 0x132   : > { %v619_v56 = vadd.f32 %v618_v54, %v440_v50  ;;  %v620_v57 = vpop.f32.mrb[22].mxu0  ;;  %861 = vmatprep.subr.bf16.mxu0 %v702_v51  ;;  %1304 = vmatprep.subr.bf16.mxu1 %v702_v51  ;;  %v738_v46 = vpop.permute.xlu0 %737 }
 0x133   : > { %v621_v58 = vadd.f32 %v620_v57, %v445_v55  ;;  %v622_v59 = vpop.f32.mrb[23].mxu0  ;;  %862 = vmatpush1.bf16.msra.mxu0 %v701_v49  ;;  %1312 = vmatpush1.bf16.msra.mxu1 %v701_v49  ;;  %v665_v61 = vmax.f32 %v617_v53, 0.0  ;;  %v743_v47 = vpop.permute.xlu1 %742 }
 0x134   : > { %v623_v60 = vadd.f32 %v622_v59, %v445_v55  ;;  %v666_v63 = vmax.f32 %v619_v56, 0.0 }
 0x135   : > { %v667_v62 = vmax.f32 %v621_v58, 0.0 }
 0x136   : > { %v668_v0 = vmax.f32 %v623_v60, 0.0  ;;  %v1017_v48 = vpop.permute.xlu0 %1016 }
 0x137   : > { %v703_v1 = vpack.c.bf16 %v667_v62, %v665_v61  ;;  %v1022_v49 = vpop.permute.xlu1 %1021 }
 0x138   : > { %v704_v3 = vpack.c.bf16 %v668_v0, %v666_v63  ;;  %v626_v4 = vpop.f32.mrb[24].mxu0 }
 0x139   : > { %v627_v5 = vadd.f32 %v626_v4, %v450_v2  ;;  %v628_v6 = vpop.f32.mrb[25].mxu0 }
 0x13a   : > { %v629_v8 = vadd.f32 %v628_v6, %v450_v2  ;;  %v630_v9 = vpop.f32.mrb[26].mxu0  ;;  %863 = vmatprep.subr.bf16.mxu0 %v704_v3  ;;  %1305 = vmatprep.subr.bf16.mxu1 %v704_v3  ;;  %v748_v50 = vpop.permute.xlu0 %747 }
 0x13b   : > { %v631_v10 = vadd.f32 %v630_v9, %v455_v7  ;;  %v632_v11 = vpop.f32.mrb[27].mxu0  ;;  %864 = vmatpush1.bf16.msra.mxu0 %v703_v1  ;;  %1313 = vmatpush1.bf16.msra.mxu1 %v703_v1  ;;  %v669_v13 = vmax.f32 %v627_v5, 0.0  ;;  %v1027_v51 = vpop.permute.xlu1 %1026 }
 0x13c   : > { %v633_v12 = vadd.f32 %v632_v11, %v455_v7  ;;  %v670_v15 = vmax.f32 %v629_v8, 0.0 }
 0x13d   : > { %v671_v14 = vmax.f32 %v631_v10, 0.0 }
 0x13e   : > { %v672_v17 = vmax.f32 %v633_v12, 0.0  ;;  %v753_v52 = vpop.permute.xlu0 %752 }
 0x13f   : > { %v705_v18 = vpack.c.bf16 %v671_v14, %v669_v13  ;;  %v1032_v53 = vpop.permute.xlu1 %1031 }
 0x140   : > { %v706_v20 = vpack.c.bf16 %v672_v17, %v670_v15  ;;  %v636_v21 = vpop.f32.mrb[28].mxu0 }
 0x141   : > { %v637_v22 = vadd.f32 %v636_v21, %v460_v19  ;;  %v638_v23 = vpop.f32.mrb[29].mxu0 }
 0x142   : > { %v639_v25 = vadd.f32 %v638_v23, %v460_v19  ;;  %v640_v26 = vpop.f32.mrb[30].mxu0  ;;  %865 = vmatprep.subr.bf16.mxu0 %v706_v20  ;;  %1306 = vmatprep.subr.bf16.mxu1 %v706_v20  ;;  %v1728_v54 = vpop.permute.xlu0 %757 }
 0x143   : > { %v641_v27 = vadd.f32 %v640_v26, %v465_v24  ;;  %v642_v28 = vpop.f32.mrb[31].mxu0  ;;  %866 = vmatpush1.bf16.msra.mxu0 %v705_v18  ;;  %1314 = vmatpush1.bf16.msra.mxu1 %v705_v18  ;;  %v673_v30 = vmax.f32 %v637_v22, 0.0  ;;  %v1037_v55 = vpop.permute.xlu1 %1036 }
 0x144   : > { %v643_v29 = vadd.f32 %v642_v28, %v465_v24  ;;  %v674_v32 = vmax.f32 %v639_v25, 0.0 }
 0x145   : > { %v675_v31 = vmax.f32 %v641_v27, 0.0 }
 0x146   : > { %v676_v33 = vmax.f32 %v643_v29, 0.0  ;;  %v1730_v56 = vpop.permute.xlu0 %762 }
 0x147   : > { %v707_v34 = vpack.c.bf16 %v675_v31, %v673_v30 }
 0x148   : > { %v708_v35 = vpack.c.bf16 %v676_v33, %v674_v32 }
 0x14a   : > { %867 = vmatprep.subr.bf16.mxu0 %v708_v35  ;;  %1307 = vmatprep.subr.bf16.mxu1 %v708_v35  ;;  %v1732_v57 = vpop.permute.xlu0 %767 }
 0x14b   : > { %868 = vmatpush1.bf16.msra.mxu0 %v707_v34  ;;  %1315 = vmatpush1.bf16.msra.mxu1 %v707_v34 }
 0x14e   : > { %886 = vmatmul.mubr.bf16.vlgmr.msra.gmra.mrb[32].mxu0 %v1352_v36  ;;  %896 = vmatmul.mubr.bf16.vlgmr.msra.gmra.mrb[0].mxu1 %v1353_v37  ;;  %v1734_v25 = vpop.permute.xlu0 %772 }
 0x14f   : > { %905 = vmatprep.mubr.bf16.mxu1 %v1392_v16 }
 0x156   : > { %906 = vmatmul.mubr.bf16.gmra.mrb[4].mxu1 %v1354_v38 }
 0x157   : > { %915 = vmatprep.mubr.bf16.mxu1 %v1392_v16 }
 0x15e   : > { %916 = vmatmul.mubr.bf16.gmra.mrb[8].mxu1 %v1355_v39 }
 0x15f   : > { %925 = vmatprep.mubr.bf16.mxu1 %v1392_v16 }
 0x166   : > { %926 = vmatmul.mubr.bf16.gmra.mrb[12].mxu1 %v1356_v40 }
 0x167   : > { %935 = vmatprep.mubr.bf16.mxu1 %v1392_v16 }
 0x16e   : > { %936 = vmatmul.mubr.bf16.gmra.mrb[16].mxu1 %v1357_v41 }
 0x16f   : > { %945 = vmatprep.mubr.bf16.mxu1 %v1392_v16 }
 0x176   : > { %946 = vmatmul.mubr.bf16.gmra.mrb[20].mxu1 %v1358_v42 }
 0x177   : > { %955 = vmatprep.mubr.bf16.mxu1 %v1392_v16  ;;  %v1042_v16 = vpop.permute.xlu1 %1041 }
 0x17b   : > { %v1047_v9 = vpop.permute.xlu1 %1046 }
 0x17e   : > { %956 = vmatmul.mubr.bf16.gmra.mrb[24].mxu1 %v1359_v43 }
 0x17f   : > { %v1052_v30 = vpop.permute.xlu1 %1051 }
 0x221   : > { %v887_v58 = vpop.f32.mrb[32].mxu0  ;;  %v897_v59 = vpop.f32.mrb[0].mxu1 }
 0x222   : > { %v888_v60 = vadd.f32 %v887_v58, %v728_v44  ;;  %v898_v61 = vadd.f32 %v897_v59, %v738_v46  ;;  %v889_v62 = vpop.f32.mrb[33].mxu0  ;;  %v899_v63 = vpop.f32.mrb[1].mxu1 }
 0x223   : > { %v890_v0 = vadd.f32 %v889_v62, %v728_v44  ;;  %v900_v1 = vadd.f32 %v899_v63, %v738_v46  ;;  %v891_v2 = vpop.f32.mrb[34].mxu0  ;;  %v901_v3 = vpop.f32.mrb[2].mxu1 }
 0x224   : > { %v966_v4 = vmax.f32 %v888_v60, 0.0  ;;  %v892_v5 = vadd.f32 %v891_v2, %v733_v45  ;;  %v902_v6 = vadd.f32 %v901_v3, %v743_v47  ;;  %v893_v7 = vpop.f32.mrb[35].mxu0  ;;  %v903_v8 = vpop.f32.mrb[3].mxu1  ;;  %v970_v13 = vmax.f32 %v898_v61, 0.0 }
 0x225   : > { %v967_v10 = vmax.f32 %v890_v0, 0.0  ;;  %v894_v11 = vadd.f32 %v893_v7, %v733_v45  ;;  %v904_v12 = vadd.f32 %v903_v8, %v743_v47  ;;  %v971_v15 = vmax.f32 %v900_v1, 0.0  ;;  %v778_v58 = vpop.permute.xlu0 %777 }
 0x226   : > { %v968_v14 = vmax.f32 %v892_v5, 0.0  ;;  %v1094_v18 = vmul.f32 %v1017_v48, %v966_v4  ;;  %v972_v20 = vmax.f32 %v902_v6, 0.0  ;;  %v1098_v26 = vmul.f32 %v1027_v51, %v970_v13 }
 0x227   : > { %v969_v17 = vmax.f32 %v894_v11, 0.0  ;;  %v1095_v21 = vmul.f32 %v1017_v48, %v967_v10  ;;  %v973_v23 = vmax.f32 %v904_v12, 0.0  ;;  %v1099_v31 = vmul.f32 %v1027_v51, %v971_v15 }
 0x228   : > { %v1096_v19 = vmul.f32 %v1022_v49, %v968_v14  ;;  %v1100_v35 = vmul.f32 %v1032_v53, %v972_v20 }
 0x229   : > { %v1097_v22 = vmul.f32 %v1022_v49, %v969_v17  ;;  %v907_v24 = vpop.f32.mrb[4].mxu1  ;;  %v1101_v40 = vmul.f32 %v1032_v53, %v973_v23  ;;  %v783_v7 = vpop.permute.xlu0 %782 }
 0x22a   : > { %v1126_v27 = vadd.f32 %v1096_v19, %v1094_v18  ;;  %v908_v28 = vadd.f32 %v907_v24, %v748_v50  ;;  %v909_v29 = vpop.f32.mrb[5].mxu1 }
 0x22b   : > { %v1147_v32 = vadd.f32 %v1097_v22, %v1095_v21  ;;  %v910_v33 = vadd.f32 %v909_v29, %v748_v50  ;;  %v911_v34 = vpop.f32.mrb[6].mxu1  ;;  %v1057_v50 = vpop.permute.xlu1 %1056 }
 0x22c   : > { %v1127_v36 = vadd.f32 %v1126_v27, %v1098_v26  ;;  %v974_v37 = vmax.f32 %v908_v28, 0.0  ;;  %v912_v38 = vadd.f32 %v911_v34, %v753_v52  ;;  %v913_v39 = vpop.f32.mrb[7].mxu1 }
 0x22d   : > { %v1148_v41 = vadd.f32 %v1147_v32, %v1099_v31  ;;  %v975_v42 = vmax.f32 %v910_v33, 0.0  ;;  %v914_v43 = vadd.f32 %v913_v39, %v753_v52 }
 0x22e   : > { %v1128_v44 = vadd.f32 %v1127_v36, %v1100_v35  ;;  %v1102_v45 = vmul.f32 %v1037_v55, %v974_v37  ;;  %v976_v46 = vmax.f32 %v912_v38, 0.0 }
 0x22f   : > { %v1149_v47 = vadd.f32 %v1148_v41, %v1101_v40  ;;  %v1103_v48 = vmul.f32 %v1037_v55, %v975_v42  ;;  %v977_v49 = vmax.f32 %v914_v43, 0.0 }
 0x230   : > { %v1129_v51 = vadd.f32 %v1128_v44, %v1102_v45  ;;  %v1104_v59 = vmul.f32 %v1042_v16, %v976_v46 }
 0x231   : > { %v1150_v60 = vadd.f32 %v1149_v47, %v1103_v48  ;;  %v1105_v61 = vmul.f32 %v1042_v16, %v977_v49  ;;  %v917_v62 = vpop.f32.mrb[8].mxu1  ;;  %v1062_v16 = vpop.permute.xlu1 %1061 }
 0x232   : > { %v1130_v63 = vadd.f32 %v1129_v51, %v1104_v59  ;;  %v918_v0 = vadd.f32 %v917_v62, %v1728_v54  ;;  %v919_v53 = vpop.f32.mrb[9].mxu1 }
 0x233   : > { %v1151_v1 = vadd.f32 %v1150_v60, %v1105_v61  ;;  %v920_v52 = vadd.f32 %v919_v53, %v1728_v54  ;;  %v921_v2 = vpop.f32.mrb[10].mxu1 }
 0x234   : > { %v978_v3 = vmax.f32 %v918_v0, 0.0  ;;  %v922_v4 = vadd.f32 %v921_v2, %v1730_v56  ;;  %v923_v55 = vpop.f32.mrb[11].mxu1 }
 0x235   : > { %v979_v5 = vmax.f32 %v920_v52, 0.0  ;;  %v924_v6 = vadd.f32 %v923_v55, %v1730_v56  ;;  %v788_v56 = vpop.permute.xlu0 %787 }
 0x236   : > { %v1106_v8 = vmul.f32 %v1047_v9, %v978_v3  ;;  %v980_v10 = vmax.f32 %v922_v4, 0.0 }
 0x237   : > { %v1107_v11 = vmul.f32 %v1047_v9, %v979_v5  ;;  %v981_v12 = vmax.f32 %v924_v6, 0.0  ;;  %v1067_v9 = vpop.permute.xlu1 %1066 }
 0x238   : > { %v1131_v13 = vadd.f32 %v1130_v63, %v1106_v8  ;;  %v1108_v14 = vmul.f32 %v1052_v30, %v980_v10 }
 0x239   : > { %v1152_v15 = vadd.f32 %v1151_v1, %v1107_v11  ;;  %v1109_v17 = vmul.f32 %v1052_v30, %v981_v12  ;;  %v927_v18 = vpop.f32.mrb[12].mxu1 }
 0x23a   : > { %v1132_v54 = vadd.f32 %v1131_v13, %v1108_v14  ;;  %v928_v19 = vadd.f32 %v927_v18, %v1732_v57  ;;  %v929_v20 = vpop.f32.mrb[13].mxu1 }
 0x23b   : > { %v1153_v21 = vadd.f32 %v1152_v15, %v1109_v17  ;;  %v930_v22 = vadd.f32 %v929_v20, %v1732_v57  ;;  %v931_v23 = vpop.f32.mrb[14].mxu1  ;;  %v793_v57 = vpop.permute.xlu0 %792 }
 0x23c   : > { %v982_v24 = vmax.f32 %v928_v19, 0.0  ;;  %v932_v26 = vadd.f32 %v931_v23, %v1734_v25  ;;  %v933_v27 = vpop.f32.mrb[15].mxu1  ;;  %v1072_v42 = vpop.permute.xlu1 %1071 }
 0x23d   : > { %v983_v28 = vmax.f32 %v930_v22, 0.0  ;;  %v934_v29 = vadd.f32 %v933_v27, %v1734_v25 }
 0x23e   : > { %v1110_v31 = vmul.f32 %v1057_v50, %v982_v24  ;;  %v984_v30 = vmax.f32 %v932_v26, 0.0 }
 0x23f   : > { %v1111_v32 = vmul.f32 %v1057_v50, %v983_v28  ;;  %v985_v33 = vmax.f32 %v934_v29, 0.0  ;;  %v798_v61 = vpop.permute.xlu0 %797 }
 0x240   : > { %v1133_v34 = vadd.f32 %v1132_v54, %v1110_v31  ;;  %v1112_v35 = vmul.f32 %v1062_v16, %v984_v30  ;;  %v1077_v0 = vpop.permute.xlu1 %1076 }
 0x241   : > { %v1154_v36 = vadd.f32 %v1153_v21, %v1111_v32  ;;  %v1113_v37 = vmul.f32 %v1062_v16, %v985_v33  ;;  %v937_v38 = vpop.f32.mrb[16].mxu1 }
 0x242   : > { %v1134_v39 = vadd.f32 %v1133_v34, %v1112_v35  ;;  %v938_v40 = vadd.f32 %v937_v38, %v778_v58  ;;  %v939_v41 = vpop.f32.mrb[17].mxu1 }
 0x243   : > { %v1155_v43 = vadd.f32 %v1154_v36, %v1113_v37  ;;  %v940_v44 = vadd.f32 %v939_v41, %v778_v58  ;;  %v941_v45 = vpop.f32.mrb[18].mxu1  ;;  %v803_v13 = vpop.permute.xlu0 %802 }
 0x244   : > { %v986_v46 = vmax.f32 %v938_v40, 0.0  ;;  %v942_v47 = vadd.f32 %v941_v45, %v783_v7  ;;  %v943_v25 = vpop.f32.mrb[19].mxu1  ;;  %v1082_v14 = vpop.permute.xlu1 %1081 }
 0x245   : > { %v987_v48 = vmax.f32 %v940_v44, 0.0  ;;  %v944_v49 = vadd.f32 %v943_v25, %v783_v7 }
 0x246   : > { %v1114_v51 = vmul.f32 %v1067_v9, %v986_v46  ;;  %v988_v59 = vmax.f32 %v942_v47, 0.0 }
 0x247   : > { %v1115_v50 = vmul.f32 %v1067_v9, %v987_v48  ;;  %v989_v60 = vmax.f32 %v944_v49, 0.0  ;;  %v1087_v31 = vpop.permute.xlu0 %1086 }
 0x248   : > { %v1135_v62 = vadd.f32 %v1134_v39, %v1114_v51  ;;  %v1116_v63 = vmul.f32 %v1072_v42, %v988_v59  ;;  %v1092_v35 = vpop.permute.xlu1 %1091  ;;  %v1169_v59 = vstv %s1168_s15 }
 0x249   : > { %v1156_v53 = vadd.f32 %v1155_v43, %v1115_v50  ;;  %v1117_v1 = vmul.f32 %v1072_v42, %v989_v60  ;;  %v947_v52 = vpop.f32.mrb[20].mxu1 }
 0x24a   : > { %v1136_v2 = vadd.f32 %v1135_v62, %v1116_v63  ;;  %v948_v3 = vadd.f32 %v947_v52, %v788_v56  ;;  %v949_v58 = vpop.f32.mrb[21].mxu1 }
 0x24b   : > { %v1157_v4 = vadd.f32 %v1156_v53, %v1117_v1  ;;  %v950_v55 = vadd.f32 %v949_v58, %v788_v56  ;;  %v951_v5 = vpop.f32.mrb[22].mxu1 }
 0x24c   : > { %v990_v6 = vmax.f32 %v948_v3, 0.0  ;;  %v952_v8 = vadd.f32 %v951_v5, %v793_v57  ;;  %v953_v7 = vpop.f32.mrb[23].mxu1 }
 0x24d   : > { %v991_v10 = vmax.f32 %v950_v55, 0.0  ;;  %v954_v16 = vadd.f32 %v953_v7, %v793_v57  ;;  %v1393_v55 = vmov 1966171168  }
 0x24e   : > { %v1118_v11 = vmul.f32 %v1077_v0, %v990_v6  ;;  %v992_v12 = vmax.f32 %v952_v8, 0.0  ;;  %v1188_v5 = vunpack.c.l.s4 %v1393_v55  ;;  %v1190_v6 = vlaneseq }
 0x24f   : > { %v1119_v15 = vmul.f32 %v1077_v0, %v991_v10  ;;  %v993_v17 = vmax.f32 %v954_v16, 0.0 }
 0x250   : > { %v1137_v18 = vadd.f32 %v1136_v2, %v1118_v11  ;;  %v1120_v54 = vmul.f32 %v1082_v14, %v992_v12  ;;  %v1189_v8 = vunpack.c.0.s8 %v1188_v5  ;;  %v1191_v7 = vshrl.u32 %v1190_v6, 7 }
 0x251   : > { %v1158_v19 = vadd.f32 %v1157_v4, %v1119_v15  ;;  %v1121_v20 = vmul.f32 %v1082_v14, %v993_v17  ;;  %v957_v21 = vpop.f32.mrb[24].mxu1  ;;  %vm1204_vm1 = vcmp.lt.s32.totalorder %v1190_v6, 256 }
 0x252   : > { %v1138_v22 = vadd.f32 %v1137_v18, %v1120_v54  ;;  %v958_v23 = vadd.f32 %v957_v21, %v798_v61  ;;  %v959_v56 = vpop.f32.mrb[25].mxu1  ;;  %v1192_v16 = vsub.s32 %v1189_v8, %v1191_v7 }
 0x253   : > { %v1159_v24 = vadd.f32 %v1158_v19, %v1121_v20  ;;  %v960_v26 = vadd.f32 %v959_v56, %v798_v61  ;;  %v961_v27 = vpop.f32.mrb[26].mxu1 }
 0x254   : > { %v994_v9 = vmax.f32 %v958_v23, 0.0  ;;  %v962_v28 = vadd.f32 %v961_v27, %v803_v13  ;;  %v963_v29 = vpop.f32.mrb[27].mxu1 }
 0x255   : > { %v995_v30 = vmax.f32 %v960_v26, 0.0  ;;  %v964_v32 = vadd.f32 %v963_v29, %v803_v13 }
 0x256   : > { %v1122_v33 = vmul.f32 %v1087_v31, %v994_v9  ;;  %v996_v34 = vmax.f32 %v962_v28, 0.0 }
 0x257   : > { %v1123_v36 = vmul.f32 %v1087_v31, %v995_v30  ;;  %v997_v37 = vmax.f32 %v964_v32, 0.0 }
 0x258   : > { %v1139_v38 = vadd.f32 %v1138_v22, %v1122_v33  ;;  %v1124_v57 = vmul.f32 %v1092_v35, %v996_v34 }
 0x259   : > { %v1160_v39 = vadd.f32 %v1159_v24, %v1123_v36  ;;  %v1125_v40 = vmul.f32 %v1092_v35, %v997_v37 }
 0x25a   : > { %v1140_v41 = vadd.f32 %v1139_v38, %v1124_v57 }
 0x25b   : > { %v1161_v42 = vadd.f32 %v1160_v39, %v1125_v40 }
 0x25c   : > { %v1141_v43 = vrot.slane %v1140_v41, 4 }
 0x25d   : > { %v1162_v44 = vrot.slane %v1161_v42, 4 }
 0x25e   : > { %v1142_v45 = vadd.f32 %v1141_v43, %v1140_v41 }
 0x25f   : > { %v1163_v46 = vadd.f32 %v1162_v44, %v1161_v42 }
 0x260   : > { %v1143_v47 = vrot.slane %v1142_v45, 2 }
 0x261   : > { %v1164_v25 = vrot.slane %v1163_v46, 2 }
 0x262   : > { %v1144_v48 = vadd.f32 %v1143_v47, %v1142_v45 }
 0x263   : > { %v1165_v49 = vadd.f32 %v1164_v25, %v1163_v46 }
 0x264   : > { %v1145_v51 = vrot.slane %v1144_v48, 1 }
 0x265   : > { %v1166_v50 = vrot.slane %v1165_v49, 1 }
 0x266   : > { %v1146_v60 = vadd.f32 %v1145_v51, %v1144_v48 }
 0x267   : > { %v1167_v61 = vadd.f32 %v1166_v50, %v1165_v49 }
 0x268   : > { %v1170_v62 = vadd.f32 %v1169_v59, %v1146_v60 }
 0x269   : > { %v1171_v63 = vadd.f32 %v1169_v59, %v1167_v61 }
 0x26a   : > { %v1172_v0 = vsub.f32 0.0, %v1170_v62 }
 0x26b   : > { %v1173_v53 = vsub.f32 0.0, %v1171_v63 }
 0x26c   : > { %v1174_v1 = vmul.f32 1.442695, %v1172_v0 }
 0x26d   : > { %v1176_v52 = vmul.f32 1.442695, %v1173_v53 }
 0x26e   : > { %1360 = vpow2.f32 %v1174_v1 }
 0x26f   : > { %1362 = vpow2.f32 %v1176_v52 }
 0x278   : > { %v1361_v2 = vpop.eup %1360 }
 0x279   : > { %v1363_v3 = vpop.eup %1362  ;;  %v1178_v58 = vadd.f32 1.0, %v1361_v2 }
 0x27a   : > { %v1179_v4 = vadd.f32 1.0, %v1363_v3 }
 0x27b   : > { %1364 = vrcp.f32 %v1178_v58 }
 0x27c   : > { %1366 = vrcp.f32 %v1179_v4 }
 0x285   : > { %v1365_v10 = vpop.eup %1364 }
 0x286   : > { %v1367_v11 = vpop.eup %1366 }
 0x287   : > { %v1186_v12 = vcombine.low %v1365_v10, %v1367_v11 }
 0x289   : > { %v1193_v13 = vrot.slane %v1186_v12, %v1192_v16 }
 0x28b   : > { %v1200_v14 = vrot.slane %v1193_v13, %v1192_v16 }
 0x28d   : > { %1206 = vst.msk [vmem:[%s328_s19] sm:$0x3] %vm1204_vm1, %v1200_v14 }
 0x28e PF: > { %p15_p9 = scmp.ge.s32.totalorder %s1454_s29, 4   ;;  %s1767_s26 = smov %s1386_s27 }
 0x28f   : > { %s1768_s27 = smov %s1463_s9  ;;  %s1769_s28 = smov %s1454_s29 }
 0x290   :  { %17 = sbr.rel (!%p15_p9) target bundleno = 4 (0x4), region = 106 }

</bundles_post_ra>
